<compile_context>
chip_gen: v7x
topology: tpu7x:2x2x1
jax: 0.10.0
libtpu: 0.0.40
codegen_flags: <defaults>
</compile_context>

<pallas_src>
import functools

import jax
import jax.numpy as jnp
from jax.experimental import pallas as pl
from jax.experimental.pallas import tpu as pltpu

LANE = 128


def _simclr_kernel(x_ref, wenc_ref, w1_ref, w2_ref, h_ref, z_ref, acc_ref, *,
                   inv_s):
    """Grid = (samples, spatial_chunks).  Spatial axis is a streamed reduction.

    x_ref   : (1, TS, C)  bf16  one spatial chunk of one sample
    wenc_ref: (C, Fp)     bf16  channel-mix (1x1 conv) weight, zero padded
    w1_ref  : (Fp, Fp)    f32   projector layer 1, zero padded
    w2_ref  : (Fp, Pp)    f32   projector layer 2, zero padded
    h_ref   : (1, 1, Fp)  f32   encoder output (after global average pool)
    z_ref   : (1, 1, Pp)  f32   projection
    acc_ref : (1, Fp)     f32   running spatial sum of ReLU features
    """
    k = pl.program_id(1)

    @pl.when(k == 0)
    def _init():
        acc_ref[...] = jnp.zeros_like(acc_ref)

    # Encoder chunk: channel mix + ReLU; global average pool becomes a running
    # sum in VMEM scratch.  (K = C is tiny for this stand-in encoder; a real
    # ResNet trunk would have K >= 64 and use the MXU properly.)
    x = x_ref[0]                                                    # (TS, C)
    feat = jnp.maximum(
        jnp.dot(x, wenc_ref[...], preferred_element_type=jnp.float32), 0.0)
    acc_ref[...] += jnp.sum(feat, axis=0, keepdims=True)            # (1, Fp)

    @pl.when(k == pl.num_programs(1) - 1)
    def _finalize():
        h = acc_ref[...] * inv_s                                    # (1, Fp)
        h_ref[0] = h
        # Projector: Linear(no bias) -> ReLU -> Linear(no bias).
        z1 = jnp.maximum(
            jnp.dot(h, w1_ref[...], preferred_element_type=jnp.float32), 0.0)
        z_ref[0] = jnp.dot(z1, w2_ref[...],
                           preferred_element_type=jnp.float32)


def simclr_forward(x_i, x_j, params, *, spatial_tile=128):
    """Mirrors SimCLR.forward: returns (h_i, h_j, z_i, z_j); weights shared."""
    wenc, w1, w2 = params
    B, C, H, W = x_i.shape
    S = H * W
    F = wenc.shape[1]
    P = w2.shape[1]
    Fp = ((F + LANE - 1) // LANE) * LANE
    Pp = ((P + LANE - 1) // LANE) * LANE

    # Fuse both branches into a single pallas_call.
    x_all = jnp.concatenate([x_i, x_j], axis=0)                     # (2B,C,H,W)
    NB = 2 * B

    # NCHW -> (NB, S, C); activations in bf16 (dominant HBM traffic).
    # TODO(synk): for a real encoder, read NCHW tiles directly in-kernel instead
    # of materialising this transpose in HBM before the pallas_call.
    x_rows = jnp.transpose(x_all, (0, 2, 3, 1)).reshape(NB, S, C)
    x_rows = x_rows.astype(jnp.bfloat16)

    # Zero-pad weights so every matmul / store is lane-dense (last dim = 128).
    wenc_p = (jnp.zeros((C, Fp), jnp.float32).at[:, :F].set(wenc)
              .astype(jnp.bfloat16))
    w1_p = jnp.zeros((Fp, Fp), jnp.float32).at[:F, :F].set(w1)
    w2_p = jnp.zeros((Fp, Pp), jnp.float32).at[:F, :P].set(w2)

    ts = spatial_tile if S % spatial_tile == 0 else S
    grid = (NB, S // ts)

    kernel = functools.partial(_simclr_kernel, inv_s=1.0 / float(S))

    h_pad, z_pad = pl.pallas_call(
        kernel,
        out_shape=(
            jax.ShapeDtypeStruct((NB, 1, Fp), jnp.float32),
            jax.ShapeDtypeStruct((NB, 1, Pp), jnp.float32),
        ),
        grid_spec=pltpu.PrefetchScalarGridSpec(
            num_scalar_prefetch=0,
            grid=grid,
            in_specs=[
                pl.BlockSpec((1, ts, C), lambda i, k: (i, k, 0)),    # x chunk
                pl.BlockSpec((C, Fp), lambda i, k: (0, 0)),          # wenc
                pl.BlockSpec((Fp, Fp), lambda i, k: (0, 0)),         # w1
                pl.BlockSpec((Fp, Pp), lambda i, k: (0, 0)),         # w2
            ],
            out_specs=[
                pl.BlockSpec((1, 1, Fp), lambda i, k: (i, 0, 0)),    # h
                pl.BlockSpec((1, 1, Pp), lambda i, k: (i, 0, 0)),    # z
            ],
            scratch_shapes=[pltpu.VMEM((1, Fp), jnp.float32)],
        ),
        compiler_params=pltpu.CompilerParams(
            dimension_semantics=("parallel", "arbitrary"),
            vmem_limit_bytes=32 * 1024 * 1024,
        ),
    )(x_rows, wenc_p, w1_p, w2_p)

    h_all = h_pad.reshape(NB, Fp)[:, :F]
    z_all = z_pad.reshape(NB, Pp)[:, :P]
    return h_all[:B], h_all[B:], z_all[:B], z_all[B:]


if __name__ == "__main__":
    # Small, deterministic shapes.
    B, C, H, W = 2, 4, 16, 16
    n_features = 32
    projection_dim = 16

    key = jax.random.PRNGKey(0)
    k_xi, k_xj, k_enc, k_w1, k_w2 = jax.random.split(key, 5)

    x_i = jax.random.normal(k_xi, (B, C, H, W), dtype=jnp.float32)
    x_j = jax.random.normal(k_xj, (B, C, H, W), dtype=jnp.float32)

    # Deterministic synthetic parameters (no checkpoint load).
    wenc = jax.random.normal(k_enc, (C, n_features), jnp.float32) * 0.1
    w1 = jax.random.normal(k_w1, (n_features, n_features), jnp.float32) * 0.1
    w2 = jax.random.normal(k_w2, (n_features, projection_dim), jnp.float32) * 0.1
    params = (wenc, w1, w2)

    h_i, h_j, z_i, z_j = simclr_forward(x_i, x_j, params)
    jax.block_until_ready((h_i, h_j, z_i, z_j))

    # Pure-JAX reference using the same bf16 rounding of x / wenc the kernel sees.
    def ref_branch(x):
        xb = jnp.transpose(x, (0, 2, 3, 1)).reshape(B, H * W, C)
        xb = xb.astype(jnp.bfloat16).astype(jnp.float32)
        wb = wenc.astype(jnp.bfloat16).astype(jnp.float32)
        feat = jnp.maximum(jnp.einsum("bsc,cf->bsf", xb, wb), 0.0)
        h = jnp.mean(feat, axis=1)
        z = jnp.maximum(h @ w1, 0.0) @ w2
        return h, z

    h_i_r, z_i_r = ref_branch(x_i)
    h_j_r, z_j_r = ref_branch(x_j)
    assert jnp.allclose(h_i, h_i_r, atol=1e-3, rtol=1e-3)
    assert jnp.allclose(h_j, h_j_r, atol=1e-3, rtol=1e-3)
    assert jnp.allclose(z_i, z_i_r, atol=1e-3, rtol=1e-3)
    assert jnp.allclose(z_j, z_j_r, atol=1e-3, rtol=1e-3)

    print("KERNEL_OK")
</pallas_src>

<mosaic_0001>
module attributes {stable_mosaic.version = 11 : i64} {
  func.func @_simclr_kernel(%arg0: i32, %arg1: i32, %arg2: memref<1x128x4xbf16, #tpu.memory_space<vmem>>, %arg3: memref<4x128xbf16, #tpu.memory_space<vmem>>, %arg4: memref<128x128xf32, #tpu.memory_space<vmem>>, %arg5: memref<128x128xf32, #tpu.memory_space<vmem>>, %arg6: memref<1x1x128xf32, #tpu.memory_space<vmem>>, %arg7: memref<1x1x128xf32, #tpu.memory_space<vmem>>, %arg8: memref<1x128xf32, #tpu.memory_space<vmem>>) attributes {dimension_semantics = [#tpu.dimension_semantics<parallel>, #tpu.dimension_semantics<arbitrary>], iteration_bounds = array<i64: 4, 2>, scalar_prefetch = 0 : i64, scratch_operands = 1 : i64, tpu.core_type = #tpu.core_type<tc>, window_params = [{transform_indices = @transform_0, window_bounds = array<i64: 1, 128, 4>}, {pipeline_mode = #tpu.pipeline_mode<synchronous>, transform_indices = @transform_1, window_bounds = array<i64: 4, 128>}, {pipeline_mode = #tpu.pipeline_mode<synchronous>, transform_indices = @transform_2, window_bounds = array<i64: 128, 128>}, {pipeline_mode = #tpu.pipeline_mode<synchronous>, transform_indices = @transform_3, window_bounds = array<i64: 128, 128>}, {transform_indices = @transform_4, window_bounds = array<i64: 1, 1, 128>}, {transform_indices = @transform_5, window_bounds = array<i64: 1, 1, 128>}]} {
    %c0_i32 = arith.constant 0 : i32
    %0 = arith.cmpi eq, %arg1, %c0_i32 : i32
    %1 = arith.extui %0 : i1 to i32
    %c0_i32_0 = arith.constant 0 : i32
    %2 = arith.cmpi ne, %1, %c0_i32_0 : i32
    scf.if %2 {
      %cst_12 = arith.constant 0.000000e+00 : f32
      %17 = vector.broadcast %cst_12 : f32 to vector<1x128xf32>
      %c0_13 = arith.constant 0 : index
      %c0_14 = arith.constant 0 : index
      %18 = vector.load %arg8[%c0_13, %c0_14] : memref<1x128xf32, #tpu.memory_space<vmem>>, vector<1x128xf32>
      tpu.vector_store %arg8[%c0_13, %c0_14], %17 {strides = array<i32>} : memref<1x128xf32, #tpu.memory_space<vmem>>, vector<1x128xf32>,
    } else {
    }
    %c0 = arith.constant 0 : index
    %c0_1 = arith.constant 0 : index
    %c0_2 = arith.constant 0 : index
    %3 = vector.load %arg2[%c0, %c0_1, %c0_2] : memref<1x128x4xbf16, #tpu.memory_space<vmem>>, vector<1x128x4xbf16>
    %4 = vector.shape_cast %3 : vector<1x128x4xbf16> to vector<128x4xbf16>
    %c0_3 = arith.constant 0 : index
    %c0_4 = arith.constant 0 : index
    %5 = vector.load %arg3[%c0_3, %c0_4] : memref<4x128xbf16, #tpu.memory_space<vmem>>, vector<4x128xbf16>
    %cst = arith.constant dense<0.000000e+00> : vector<128x128xf32>
    %6 = tpu.matmul %4, %5, %cst {dimension_numbers = #tpu.dot_dimension_numbers<[1], [0], [0], [1], [0, 0, 1, 1], [], []>} : vector<128x4xbf16>, vector<4x128xbf16>, vector<128x128xf32> -> vector<128x128xf32>
    %cst_5 = arith.constant 0.000000e+00 : f32
    %7 = vector.broadcast %cst_5 : f32 to vector<128x128xf32>
    %8 = arith.maximumf %6, %7 : vector<128x128xf32>
    %c0_6 = arith.constant 0 : index
    %c0_7 = arith.constant 0 : index
    %9 = vector.load %arg8[%c0_6, %c0_7] : memref<1x128xf32, #tpu.memory_space<vmem>>, vector<1x128xf32>
    %cst_8 = arith.constant dense<0.000000e+00> : vector<128xf32>
    %10 = vector.multi_reduction <add>, %8, %cst_8 [0] : vector<128x128xf32> to vector<128xf32>
    %11 = vector.shape_cast %10 : vector<128xf32> to vector<1x128xf32>
    %12 = arith.addf %9, %11 : vector<1x128xf32>
    %c0_9 = arith.constant 0 : index
    %c0_10 = arith.constant 0 : index
    %13 = vector.load %arg8[%c0_9, %c0_10] : memref<1x128xf32, #tpu.memory_space<vmem>>, vector<1x128xf32>
    tpu.vector_store %arg8[%c0_9, %c0_10], %12 {strides = array<i32>} : memref<1x128xf32, #tpu.memory_space<vmem>>, vector<1x128xf32>,
    %c1_i32 = arith.constant 1 : i32
    %14 = arith.cmpi eq, %arg1, %c1_i32 : i32
    %15 = arith.extui %14 : i1 to i32
    %c0_i32_11 = arith.constant 0 : i32
    %16 = arith.cmpi ne, %15, %c0_i32_11 : i32
    scf.if %16 {
      %c0_12 = arith.constant 0 : index
      %c0_13 = arith.constant 0 : index
      %17 = vector.load %arg8[%c0_12, %c0_13] : memref<1x128xf32, #tpu.memory_space<vmem>>, vector<1x128xf32>
      %cst_14 = arith.constant 3.906250e-03 : f32
      %18 = vector.broadcast %cst_14 : f32 to vector<1x128xf32>
      %19 = arith.mulf %17, %18 : vector<1x128xf32>
      %c0_15 = arith.constant 0 : index
      %c0_16 = arith.constant 0 : index
      %c0_17 = arith.constant 0 : index
      %20 = vector.load %arg6[%c0_15, %c0_16, %c0_17] : memref<1x1x128xf32, #tpu.memory_space<vmem>>, vector<1x1x128xf32>
      %21 = vector.shape_cast %20 : vector<1x1x128xf32> to vector<1x128xf32>
      %22 = vector.shape_cast %19 : vector<1x128xf32> to vector<1x1x128xf32>
      tpu.vector_store %arg6[%c0_15, %c0_16, %c0_17], %22 {strides = array<i32>} : memref<1x1x128xf32, #tpu.memory_space<vmem>>, vector<1x1x128xf32>,
      %c0_18 = arith.constant 0 : index
      %c0_19 = arith.constant 0 : index
      %23 = vector.load %arg4[%c0_18, %c0_19] : memref<128x128xf32, #tpu.memory_space<vmem>>, vector<128x128xf32>
      %cst_20 = arith.constant dense<0.000000e+00> : vector<1x128xf32>
      %24 = tpu.matmul %19, %23, %cst_20 {dimension_numbers = #tpu.dot_dimension_numbers<[1], [0], [0], [1], [0, 0, 1, 1], [], []>} : vector<1x128xf32>, vector<128x128xf32>, vector<1x128xf32> -> vector<1x128xf32>
      %cst_21 = arith.constant 0.000000e+00 : f32
      %25 = vector.broadcast %cst_21 : f32 to vector<1x128xf32>
      %26 = arith.maximumf %24, %25 : vector<1x128xf32>
      %c0_22 = arith.constant 0 : index
      %c0_23 = arith.constant 0 : index
      %27 = vector.load %arg5[%c0_22, %c0_23] : memref<128x128xf32, #tpu.memory_space<vmem>>, vector<128x128xf32>
      %cst_24 = arith.constant dense<0.000000e+00> : vector<1x128xf32>
      %28 = tpu.matmul %26, %27, %cst_24 {dimension_numbers = #tpu.dot_dimension_numbers<[1], [0], [0], [1], [0, 0, 1, 1], [], []>} : vector<1x128xf32>, vector<128x128xf32>, vector<1x128xf32> -> vector<1x128xf32>
      %c0_25 = arith.constant 0 : index
      %c0_26 = arith.constant 0 : index
      %c0_27 = arith.constant 0 : index
      %29 = vector.load %arg7[%c0_25, %c0_26, %c0_27] : memref<1x1x128xf32, #tpu.memory_space<vmem>>, vector<1x1x128xf32>
      %30 = vector.shape_cast %29 : vector<1x1x128xf32> to vector<1x128xf32>
      %31 = vector.shape_cast %28 : vector<1x128xf32> to vector<1x1x128xf32>
      tpu.vector_store %arg7[%c0_25, %c0_26, %c0_27], %31 {strides = array<i32>} : memref<1x1x128xf32, #tpu.memory_space<vmem>>, vector<1x1x128xf32>,
    } else {
    }
    return
  }
  func.func @transform_0(%arg0: i32, %arg1: i32) -> (i32, i32, i32) {
    %c0_i32 = arith.constant 0 : i32
    %c0_i32_0 = arith.constant 0 : i32
    return %arg0, %arg1, %c0_i32 : i32, i32, i32
  }
  func.func @transform_1(%arg0: i32, %arg1: i32) -> (i32, i32) {
    %c0_i32 = arith.constant 0 : i32
    %c0_i32_0 = arith.constant 0 : i32
    %c0_i32_1 = arith.constant 0 : i32
    return %c0_i32, %c0_i32_0 : i32, i32
  }
  func.func @transform_2(%arg0: i32, %arg1: i32) -> (i32, i32) {
    %c0_i32 = arith.constant 0 : i32
    %c0_i32_0 = arith.constant 0 : i32
    %c0_i32_1 = arith.constant 0 : i32
    return %c0_i32, %c0_i32_0 : i32, i32
  }
  func.func @transform_3(%arg0: i32, %arg1: i32) -> (i32, i32) {
    %c0_i32 = arith.constant 0 : i32
    %c0_i32_0 = arith.constant 0 : i32
    %c0_i32_1 = arith.constant 0 : i32
    return %c0_i32, %c0_i32_0 : i32, i32
  }
  func.func @transform_4(%arg0: i32, %arg1: i32) -> (i32, i32, i32) {
    %c0_i32 = arith.constant 0 : i32
    %c0_i32_0 = arith.constant 0 : i32
    %c0_i32_1 = arith.constant 0 : i32
    return %arg0, %c0_i32, %c0_i32_0 : i32, i32, i32
  }
  func.func @transform_5(%arg0: i32, %arg1: i32) -> (i32, i32, i32) {
    %c0_i32 = arith.constant 0 : i32
    %c0_i32_0 = arith.constant 0 : i32
    %c0_i32_1 = arith.constant 0 : i32
    return %arg0, %c0_i32, %c0_i32_0 : i32, i32, i32
  }
}

</mosaic_0001>

<bundles_post_ra>
// kernel: tpu_custom_call.1
= control target key start
LH: loop header
LB: loop body
LE: loop exit
PB: predicated region body
PF: predicated region fallthrough
CT: control target
= control target key end

     0   :  { %s1561_s0 = inlined_call_operand.vmem [shape: bf16[4,256,4], index: 0, kind: input, shape index: {}]   ;;  %s1562_s1 = inlined_call_operand.vmem [shape: bf16[4,128], index: 1, kind: input, shape index: {}]   ;;  %s1563_s2 = inlined_call_operand.vmem [shape: f32[128,128], index: 2, kind: input, shape index: {}]   ;;  %s1564_s3 = inlined_call_operand.vmem [shape: f32[128,128], index: 3, kind: input, shape index: {}]   ;;  %s1565_s4 = inlined_call_operand.hbm [shape: f32[4,1,128], index: 4, kind: output, shape index: {0}]   ;;  %s1566_s5 = inlined_call_operand.hbm [shape: f32[4,1,128], index: 5, kind: output, shape index: {1}]  }
   0x1   :  { %1568 = sst [smem:[#allocation10_spill]] %s1561_s0 }
   0x2   :  { %11 = vsyncpa [#allocation4], 0 }
   0x3   :  { %13 = vsyncpa [#allocation4 + $0x1], 0 }
   0x4   :  { %14 = vsyncpa [#allocation6], 0 }
   0x5   :  { %16 = vsyncpa [#allocation6 + $0x1], 0  ;;  %s1265_s18 = smov 0   ;;  %s1267_s19 = smov 0  }
   0x6   :  { %s1269_s20 = smov 0   ;;  %s1271_s21 = smov 0  }
   0x7   :  { %s1273_s22 = smov 0   ;;  %s1275_s23 = smov 0  }
   0x8   :  { %s1277_s24 = smov 0   ;;  %s1279_s25 = smov 0  }
   0x9 LB: > { %s800_s26 = sadd.s32 4294967295, %s1227_s25   ;;  %s801_s27 = sadd.s32 4294967294, %s1227_s25   ;;  %s1227_s25 = sphi %s1279_s25, %s22_s25   ;;  %s1223_s24 = sphi %s1277_s24, %s1580_s24   ;;  %s1219_s23 = sphi %s1275_s23, %s1579_s23   ;;  %s1215_s22 = sphi %s1273_s22, %s1578_s22   ;;  %s1211_s21 = sphi %s1271_s21, %s1577_s21   ;;  %s1207_s20 = sphi %s1269_s20, %s1576_s20   ;;  %s1203_s19 = sphi %s1267_s19, %s1575_s19   ;;  %s1199_s18 = sphi %s1265_s18, %s1574_s18  }
   0xa   : > { %s31_s28 = sadd.s32 1, %s1219_s23  ;;  %s34_s29 = sadd.s32 1, %s1223_s24 }
   0xb   : > { %p32_p0 = scmp.ge.s32.totalorder %s31_s28, 2  ;;  %p142_p1 = scmp.ne.s32.totalorder %s1207_s20, %s1203_s19 }
   0xc   : > { %p143_p2 = scmp.eq.s32.totalorder %s800_s26, 7  ;;  %p148_p4 = scmp.ne.s32.totalorder %s1203_s19, %s1199_s18 }
   0xd   : > { %s1582_s28 = smov (%p32_p0, %s31_s28), 0  ;;  %s1584_s29 = smov (!%p32_p0, %s34_s29), %s1223_s24 }
   0xe   : > { %p1314_p3 = por %p143_p2, %p142_p1  ;;  %p36_p5 = scmp.ge.s32.totalorder %s1584_s29, 4 }
   0xf   : > { %p149_p6 = scmp.eq.s32.totalorder %s801_s27, 7  ;;  %p804_p7 = scmp.ge.s32.totalorder %s1227_s25, 1 }
  0x10   : > { %p215_p8 = scmp.lt.s32.totalorder %s1227_s25, 9  ;;  %s1586_s29 = smov (%p36_p5, %s1584_s29), 0 }
  0x11   : > { %1570 = sst [smem:[#allocation9_spill]] %s1586_s29  ;;  %p1324_p9 = por %p149_p6, %p148_p4 }
  0x12   : > { %p216_p10 = pnand %p804_p7, %p215_p8  ;;  %s129_s7 = ssub.s32 %s1223_s24, %s1586_s29 }
  0x13   : > { %s132_s8 = sadd.s32 1, %s1207_s20  ;;  %p130_p11 = scmp.eq.s32.totalorder %s129_s7, 0 }
  0x14   : > { %219 = sbr.rel (%p216_p10) target bundleno = 786 (0x312), region = 36  ;;  %s1335_s10 = sand.u32 (!%p216_p10), 1, %s1203_s19  }
  0x15   : > { %s1332_s9 = scalar_select %p130_p11, %s1207_s20, %s132_s8  }
  0x16   : > { %s805_s11 = sshll.u32 (!%p216_p10), %s1211_s21, 4  ;;  %p251_p12 = scmp.lt.s32.totalorder (!%p216_p10), %s1215_s22, 3 }
  0x17   : > { %p253_p13 = scmp.lt.s32.totalorder (!%p216_p10), %s805_s11, 31  ;;  %s1572_s0 = sld [smem:[#allocation10_spill]] (!%p216_p10) }
  0x18   : > { %s243_s27 = scalar_lea.vmem (!%p216_p10), [#allocation3], %s1335_s10  ;;  %s249_s7 = scalar_lea.vmem (!%p216_p10), [#allocation5], %s1335_s10 }
  0x19   : > { %p808_p0 = scmp.ne.s32.totalorder (!%p216_p10), %s1211_s21, 0 }
  0x1b   : > { %s252_s12 = scalar_select %p251_p12, %s1215_s22, 3 }
  0x1c   : > { %s1588_s11 = smov (!%p253_p13, %s805_s11), 31  ;;  %264 = sbr.rel (%p808_p0) target bundleno = 35 (0x23), region = 40 }
  0x1d   : > { %s806_s13 = sshll.u32 %s252_s12, 5  ;;  %v1229_v0 = vmov (!%p808_p0), 0.0  }
  0x1e   : > { %s256_s14 = sadd.s32 %s806_s13, %s1588_s11  ;;  %265 = vst [vmem:[#allocation2] sm:$0x1] (!%p808_p0), %v1229_v0 }
  0x1f   : > { %s807_s15 = sshll.u32 %s256_s14, 2 }
  0x20   : > { %s258_s26 = scalar_lea.vmem %s1572_s0, %s807_s15 }
  0x23 PF: > { %v282_v1 = vld [vmem:[%s1562_s1] sm:$0x3]  ;;  %vm348_vm0 = vcmask 1041408   ;;  %vm323_vm1 = vcmask 31744   ;;  %v1094_v4 = vld [vmem:[%s258_s26 + $0x8] sm:$0xff]   ;;  %v1095_v5 = vld [vmem:[%s258_s26 + $0x10] sm:$0xff]  }
  0x24   : > { %v1093_v2 = vld [vmem:[%s258_s26] sm:$0xff]   ;;  %1011 = vmatprep.subr.msk.bf16.mxu0 %vm348_vm0, %v282_v1  ;;  %v350_v3 = vsel %vm348_vm0, %v282_v1, 0  ;;  %1012 = vmatprep.subr.msk.bf16.mxu1 %vm348_vm0, %v282_v1  ;;  %v1098_v7 = vld [vmem:[%s258_s26 + $0x28] sm:$0xff]   ;;  %v1099_v8 = vld [vmem:[%s258_s26 + $0x30] sm:$0xff]   ;;  %p825_p1 = scmp.ne.s32.totalorder %s1211_s21, 1 }
  0x25   : > { %874 = vmatpush3.bf16.msra.mxu0 %v350_v3  ;;  %875 = vmatprep.mubr.msk.bf16.mxu0 %vm323_vm1, %v1093_v2  ;;  %v1097_v6 = vld [vmem:[%s258_s26 + $0x20] sm:$0xff]   ;;  %v1096_v9 = vld [vmem:[%s258_s26 + $0x18] sm:$0xff]   ;;  %vm1231_vm2 = vmmov (!%p825_p1), 0  }
  0x26   : > { %1010 = vmatpush3.bf16.msra.mxu1 %v350_v3  ;;  %883 = vmatprep.mubr.msk.bf16.mxu1 %vm323_vm1, %v1097_v6  ;;  %v1100_v10 = vld [vmem:[%s258_s26 + $0x38] sm:$0xff]   ;;  %v465_v63 = vld [vmem:[#allocation2] sm:$0x1]  ;;  %v497_v3 = vld [vmem:[%s1563_s2 + $0x8] sm:$0xff] (!%p825_p1) }
  0x27   : > { %v496_v2 = vld [vmem:[%s1563_s2] sm:$0xff] (!%p825_p1) }
  0x28   : > { %876 = vmatmul.mubr.msk.bf16.vlgmr.msra.gmra.mrb[0].mxu0 %vm323_vm1, %v1094_v4  ;;  %v498_v4 = vld [vmem:[%s1563_s2 + $0x10] sm:$0xff] (!%p825_p1)  ;;  %v962_v6 = vpack.c.bf16 (!%p825_p1), %v497_v3, %v496_v2 }
  0x29   : > { %879 = vmatprep.mubr.msk.bf16.mxu0 %vm323_vm1, %v1095_v5  ;;  %884 = vmatmul.mubr.msk.bf16.vlgmr.msra.gmra.mrb[0].mxu1 %vm323_vm1, %v1098_v7  ;;  %v1230_v5 = vmov (!%p825_p1), 0.0|0.0   ;;  %v499_v7 = vld [vmem:[%s1563_s2 + $0x18] sm:$0xff] (!%p825_p1) }
  0x2a   : > { %887 = vmatprep.mubr.msk.bf16.mxu1 %vm323_vm1, %v1099_v8  ;;  %961 = vmatprep.subr.bf16.mxu0 (!%p825_p1), %v1230_v5  ;;  %v1232_v8 = vmov (!%p825_p1), 0.0  }
  0x2b   : > { %985 = vmatprep.subr.bf16.mxu1 (!%p825_p1), %v1230_v5  ;;  %963 = vmatpush3.bf16.msra.mxu0 (!%p825_p1), %v962_v6 }
  0x2c   : > { %964 = vmatprep.subr.bf16.mxu0 (!%p825_p1), %v1230_v5 }
  0x30   : > { %880 = vmatmul.mubr.msk.bf16.gmra.mrb[4].mxu0 %vm323_vm1, %v1096_v9  ;;  %v965_v9 = vpack.c.bf16 (!%p825_p1), %v499_v7, %v498_v4 }
  0x31   : > { %888 = vmatmul.mubr.msk.bf16.gmra.mrb[4].mxu1 %vm323_vm1, %v1100_v10  ;;  %923 = vmatprep.mubr.msk.f32.mxu0 (!%p825_p1), %vm1231_vm2, %v1232_v8  ;;  %v500_v10 = vld [vmem:[%s1563_s2 + $0x20] sm:$0xff] (!%p825_p1) }
  0x32   : > { %958 = vmatprep.mubr.msk.f32.mxu1 (!%p825_p1), %vm1231_vm2, %v1232_v8  ;;  %966 = vmatpush3.bf16.msra.mxu0 (!%p825_p1), %v965_v9 }
  0x33   : > { %967 = vmatprep.subr.bf16.mxu0 (!%p825_p1), %v1230_v5 }
  0xfb   : > { %v877_v11 = vpop.f32.mrb[0].mxu0 }
  0xfc   : > { %v386_v12 = vpop.f32.mrb[1].mxu0  ;;  %v885_v15 = vpop.f32.mrb[0].mxu1  ;;  %v451_v20 = vmax.f32 %v877_v11, 0.0  ;;  %v501_v11 = vld [vmem:[%s1563_s2 + $0x28] sm:$0xff] (!%p825_p1) }
  0xfd   : > { %v878_v13 = vpop.f32.mrb[2].mxu0  ;;  %v449_v16 = vmax.f32 %v386_v12, 0.0  ;;  %v418_v18 = vpop.f32.mrb[1].mxu1  ;;  %v459_v45 = vmax.f32 %v885_v15, 0.0  ;;  %v584_v15 = vld [vmem:[%s1564_s3 + $0x8] sm:$0xff] (!%p825_p1) }
  0xfe   : > { %v389_v14 = vpop.f32.mrb[3].mxu0  ;;  %v886_v19 = vpop.f32.mrb[2].mxu1  ;;  %v452_v23 = vmax.f32 %v878_v13, 0.0  ;;  %v457_v41 = vmax.f32 %v418_v18, 0.0  ;;  %v583_v13 = vld [vmem:[%s1564_s3] sm:$0xff] (!%p825_p1)  ;;  %v968_v18 = vpack.c.bf16 (!%p825_p1), %v501_v11, %v500_v10 }
  0xff   : > { %v450_v17 = vmax.f32 %v389_v14, 0.0  ;;  %v421_v22 = vpop.f32.mrb[3].mxu1  ;;  %v460_v47 = vmax.f32 %v886_v19, 0.0  ;;  %v986_v19 = vpack.c.bf16 (!%p825_p1), %v584_v15, %v583_v13 }
 0x100   : > { %v458_v44 = vmax.f32 %v421_v22, 0.0  ;;  %969 = vmatpush3.bf16.msra.mxu0 (!%p825_p1), %v968_v18 }
 0x101   : > { %v466_v21 = vadd.f32 %v450_v17, %v449_v16  ;;  %v585_v16 = vld [vmem:[%s1564_s3 + $0x10] sm:$0xff] (!%p825_p1)  ;;  %v586_v17 = vld [vmem:[%s1564_s3 + $0x18] sm:$0xff] (!%p825_p1)  ;;  %987 = vmatpush3.bf16.msra.mxu1 (!%p825_p1), %v986_v19  ;;  %970 = vmatprep.subr.bf16.mxu0 (!%p825_p1), %v1230_v5 }
 0x102   : > { %v989_v22 = vpack.c.bf16 (!%p825_p1), %v586_v17, %v585_v16  ;;  %988 = vmatprep.subr.bf16.mxu1 (!%p825_p1), %v1230_v5 }
 0x103   : > { %v467_v24 = vadd.f32 %v466_v21, %v451_v20  ;;  %v881_v25 = vpop.f32.mrb[4].mxu0  ;;  %v502_v20 = vld [vmem:[%s1563_s2 + $0x30] sm:$0xff] (!%p825_p1)  ;;  %v503_v21 = vld [vmem:[%s1563_s2 + $0x38] sm:$0xff] (!%p825_p1) }
 0x104   : > { %v402_v26 = vpop.f32.mrb[5].mxu0  ;;  %v889_v31 = vpop.f32.mrb[4].mxu1  ;;  %v455_v36 = vmax.f32 %v881_v25, 0.0  ;;  %v971_v25 = vpack.c.bf16 (!%p825_p1), %v503_v21, %v502_v20 }
 0x105   : > { %v453_v27 = vmax.f32 %v402_v26, 0.0  ;;  %v468_v28 = vadd.f32 %v467_v24, %v452_v23  ;;  %v882_v29 = vpop.f32.mrb[6].mxu0  ;;  %v434_v34 = vpop.f32.mrb[5].mxu1  ;;  %v463_v53 = vmax.f32 %v889_v31, 0.0  ;;  %v587_v23 = vld [vmem:[%s1564_s3 + $0x20] sm:$0xff] (!%p825_p1)  ;;  %v588_v24 = vld [vmem:[%s1564_s3 + $0x28] sm:$0xff] (!%p825_p1)  ;;  %990 = vmatpush3.bf16.msra.mxu1 (!%p825_p1), %v989_v22 }
 0x106   : > { %v405_v30 = vpop.f32.mrb[7].mxu0  ;;  %v890_v35 = vpop.f32.mrb[6].mxu1  ;;  %v456_v39 = vmax.f32 %v882_v29, 0.0  ;;  %v461_v49 = vmax.f32 %v434_v34, 0.0  ;;  %v504_v26 = vld [vmem:[%s1563_s2 + $0x40] sm:$0xff] (!%p825_p1)  ;;  %991 = vmatprep.subr.bf16.mxu1 (!%p825_p1), %v1230_v5  ;;  %v589_v29 = vld [vmem:[%s1564_s3 + $0x30] sm:$0xff] (!%p825_p1)  ;;  %972 = vmatpush3.bf16.msra.mxu0 (!%p825_p1), %v971_v25 }
 0x107   : > { %v469_v32 = vadd.f32 %v468_v28, %v453_v27  ;;  %v454_v33 = vmax.f32 %v405_v30, 0.0  ;;  %v437_v38 = vpop.f32.mrb[7].mxu1  ;;  %v464_v55 = vmax.f32 %v890_v35, 0.0  ;;  %v505_v27 = vld [vmem:[%s1563_s2 + $0x48] sm:$0xff] (!%p825_p1)  ;;  %v992_v28 = vpack.c.bf16 (!%p825_p1), %v588_v24, %v587_v23  ;;  %v590_v30 = vld [vmem:[%s1564_s3 + $0x38] sm:$0xff] (!%p825_p1)  ;;  %973 = vmatprep.subr.bf16.mxu0 (!%p825_p1), %v1230_v5  ;;  %v591_v35 = vld [vmem:[%s1564_s3 + $0x40] sm:$0xff] (!%p825_p1) }
 0x108   : > { %v462_v52 = vmax.f32 %v437_v38, 0.0  ;;  %v974_v31 = vpack.c.bf16 (!%p825_p1), %v505_v27, %v504_v26  ;;  %v995_v34 = vpack.c.bf16 (!%p825_p1), %v590_v30, %v589_v29  ;;  %v508_v38 = vld [vmem:[%s1563_s2 + $0x60] sm:$0xff] (!%p825_p1) }
 0x109   : > { %v470_v37 = vadd.f32 %v469_v32, %v454_v33  ;;  %v506_v32 = vld [vmem:[%s1563_s2 + $0x50] sm:$0xff] (!%p825_p1)  ;;  %v507_v33 = vld [vmem:[%s1563_s2 + $0x58] sm:$0xff] (!%p825_p1)  ;;  %993 = vmatpush3.bf16.msra.mxu1 (!%p825_p1), %v992_v28 }
 0x10a   : > { %994 = vmatprep.subr.bf16.mxu1 (!%p825_p1), %v1230_v5  ;;  %975 = vmatpush3.bf16.msra.mxu0 (!%p825_p1), %v974_v31 }
 0x10b   : > { %v471_v40 = vadd.f32 %v470_v37, %v455_v36  ;;  %v592_v36 = vld [vmem:[%s1564_s3 + $0x48] sm:$0xff] (!%p825_p1)  ;;  %v977_v37 = vpack.c.bf16 (!%p825_p1), %v507_v33, %v506_v32  ;;  %976 = vmatprep.subr.bf16.mxu0 (!%p825_p1), %v1230_v5 }
 0x10d   : > { %v472_v42 = vadd.f32 %v471_v40, %v456_v39  ;;  %v509_v39 = vld [vmem:[%s1563_s2 + $0x68] sm:$0xff] (!%p825_p1)  ;;  %996 = vmatpush3.bf16.msra.mxu1 (!%p825_p1), %v995_v34  ;;  %v998_v40 = vpack.c.bf16 (!%p825_p1), %v592_v36, %v591_v35 }
 0x10e   : > { %997 = vmatprep.subr.bf16.mxu1 (!%p825_p1), %v1230_v5  ;;  %978 = vmatpush3.bf16.msra.mxu0 (!%p825_p1), %v977_v37 }
 0x10f   : > { %v473_v43 = vadd.f32 %v472_v42, %v457_v41  ;;  %v593_v41 = vld [vmem:[%s1564_s3 + $0x50] sm:$0xff] (!%p825_p1)  ;;  %v594_v42 = vld [vmem:[%s1564_s3 + $0x58] sm:$0xff] (!%p825_p1)  ;;  %979 = vmatprep.subr.bf16.mxu0 (!%p825_p1), %v1230_v5 }
 0x111   : > { %v474_v46 = vadd.f32 %v473_v43, %v458_v44  ;;  %v980_v43 = vpack.c.bf16 (!%p825_p1), %v509_v39, %v508_v38  ;;  %v510_v44 = vld [vmem:[%s1563_s2 + $0x70] sm:$0xff] (!%p825_p1)  ;;  %999 = vmatpush3.bf16.msra.mxu1 (!%p825_p1), %v998_v40 }
 0x112   : > { %1000 = vmatprep.subr.bf16.mxu1 (!%p825_p1), %v1230_v5 }
 0x113   : > { %v475_v48 = vadd.f32 %v474_v46, %v459_v45  ;;  %v511_v45 = vld [vmem:[%s1563_s2 + $0x78] sm:$0xff] (!%p825_p1)  ;;  %v1001_v46 = vpack.c.bf16 (!%p825_p1), %v594_v42, %v593_v41  ;;  %981 = vmatpush3.bf16.msra.mxu0 (!%p825_p1), %v980_v43 }
 0x114   : > { %982 = vmatprep.subr.bf16.mxu0 (!%p825_p1), %v1230_v5 }
 0x115   : > { %v476_v50 = vadd.f32 %v475_v48, %v460_v47  ;;  %v595_v47 = vld [vmem:[%s1564_s3 + $0x60] sm:$0xff] (!%p825_p1)  ;;  %v596_v48 = vld [vmem:[%s1564_s3 + $0x68] sm:$0xff] (!%p825_p1)  ;;  %1002 = vmatpush3.bf16.msra.mxu1 (!%p825_p1), %v1001_v46 }
 0x116   : > { %1003 = vmatprep.subr.bf16.mxu1 (!%p825_p1), %v1230_v5 }
 0x117   : > { %v477_v51 = vadd.f32 %v476_v50, %v461_v49  ;;  %v983_v49 = vpack.c.bf16 (!%p825_p1), %v511_v45, %v510_v44  ;;  %v1004_v50 = vpack.c.bf16 (!%p825_p1), %v596_v48, %v595_v47 }
 0x119   : > { %v478_v54 = vadd.f32 %v477_v51, %v462_v52  ;;  %984 = vmatpush3.bf16.msra.mxu0 (!%p825_p1), %v983_v49  ;;  %1005 = vmatpush3.bf16.msra.mxu1 (!%p825_p1), %v1004_v50  ;;  %v597_v51 = vld [vmem:[%s1564_s3 + $0x70] sm:$0xff] (!%p825_p1)  ;;  %v598_v52 = vld [vmem:[%s1564_s3 + $0x78] sm:$0xff] (!%p825_p1) }
 0x11a   : > { %1006 = vmatprep.subr.bf16.mxu1 (!%p825_p1), %v1230_v5 }
 0x11b   : > { %v479_v56 = vadd.f32 %v478_v54, %v463_v53  ;;  %v1007_v53 = vpack.c.bf16 (!%p825_p1), %v598_v52, %v597_v51 }
 0x11d   : > { %v480_v57 = vadd.f32 %v479_v56, %v464_v55  ;;  %1008 = vmatpush3.bf16.msra.mxu1 (!%p825_p1), %v1007_v53 }
 0x11f   : > { %v481_v58 = vrot.slane %v480_v57, 4 }
 0x121   : > { %v482_v59 = vadd.f32 %v481_v58, %v480_v57 }
 0x123   : > { %v483_v60 = vrot.slane %v482_v59, 2 }
 0x125   : > { %v484_v61 = vadd.f32 %v483_v60, %v482_v59 }
 0x127   : > { %v485_v62 = vrot.slane %v484_v61, 1  ;;  %492 = sbr.rel (%p825_p1) target bundleno = 738 (0x2e2), region = 44 }
 0x129   : > { %v486_v0 = vadd.f32 %v485_v62, %v484_v61 }
 0x12b   : > { %v487_v1 = vadd.f32 %v486_v0, %v465_v63 }
 0x12d   : > { %488 = vst [vmem:[#allocation2] sm:$0x1] %v487_v1 }
 0x134   : > { %v493_v12 = vld [vmem:[#allocation2] sm:$0x1] }
 0x135   : > { %v1382_v14 = vmul.f32 0.00390625, %v493_v12 }
 0x137   : > { %495 = vst [vmem:[%s243_s27] sm:$0x1] %v1382_v14  ;;  %924 = vmatmul.mubr.f32.vlgmr.msra.gmra.mrb[0].mxu0 %v1382_v14 }
 0x20a   : > { %v578_v54 = vpop.f32.mrb[0].mxu0 }
 0x20b   : > { %v582_v55 = vmax.f32 %v578_v54, 0.0  ;;  %v925_v56 = vpop.f32.mrb[1].mxu0 }
 0x20d   : > { %959 = vmatmul.mubr.f32.vlgmr.msra.gmra.mrb[0].mxu1 %v582_v55 }
 0x2e0   : > { %v665_v57 = vpop.f32.mrb[0].mxu1 }
 0x2e1   : > { %669 = vst [vmem:[%s249_s7] sm:$0x1] %v665_v57  ;;  %v960_v58 = vpop.f32.mrb[1].mxu1 }
 0x2e2 PF: > { %s826_s26 = sshll.u32 %s1215_s22, 4  ;;  %s687_s12 = sshll.u32 %s243_s27, 4  ;;  %s688_s12 = int_to_ptr.vmem [resolvable:$true] %s687_s12 }
 0x2e3   : > { %s1484_s11 = scalar_lea.hbm %s1565_s4, %s826_s26  ;;  %s671_s13 = scalar_lea.sflag [#allocation4], %s1335_s10 }
 0x2e4   : > { %s1101_s14 = scalar_lea.vmem %s688_s12, 16  ;;  %s1233_s15 = smov [#allocation3]  }
 0x2e5   : > { %p1102_p2 = scmp.ne.s32.totalorder %s688_s12, %s1101_s14  ;;  %s1105_s16 = sshll.u32 %s1233_s15, 4  ;;  %s1106_s16 = int_to_ptr.vmem [resolvable:$false] %s1105_s16 }
 0x2e6   : > { %s1107_s17 = scalar_lea.vmem %s1106_s16, 32  ;;  %p1108_p6 = scmp.lt.s32.totalorder %s688_s12, %s1106_s16 }
 0x2e7   : > { %p1103_p4 = pnand %p1102_p2, %p1314_p3  ;;  %p1109_p7 = scmp.lt.s32.totalorder %s1107_s17, %s1101_s14 }
 0x2e9   : > { %p1104_p5 = pneg %p1103_p4  ;;  %p1110_p8 = por %p1109_p7, %p1108_p6 }
 0x2eb   : > { %p1111_p10 = pnand %p1110_p8, %p1104_p5 }
 0x2ed   : > { %1114 = shalt.err (!%p1111_p10)
}
 0x2ee   : > { %s1115_s27 = scalar_lea.hbm %s1484_s11, 16  ;;  %s1119_s29 = scalar_lea.hbm %s1565_s4, 64 }
 0x2ef   : > { %p1116_p11 = scmp.ne.s32.totalorder %s1484_s11, %s1115_s27  ;;  %p1120_p0 = scmp.lt.u32.totalorder %s1484_s11, %s1565_s4 }
 0x2f0   : > { %p1121_p1 = scmp.lt.u32.totalorder %s1119_s29, %s1115_s27  ;;  %p1123_p4 = scmp.lt.u32.totalorder %s1115_s27, %s1484_s11 }
 0x2f1   : > { %p1117_p12 = pnand %p1116_p11, %p1314_p3 }
 0x2f2   : > { %p1122_p2 = por %p1121_p1, %p1120_p0 }
 0x2f3   : > { %p1118_p13 = pneg %p1117_p12 }
 0x2f4   : > { %p1124_p5 = por %p1123_p4, %p1122_p2 }
 0x2f6   : > { %p1125_p6 = pnand %p1124_p5, %p1118_p13 }
 0x2f8   : > { %1128 = shalt.err (!%p1125_p6)
}
 0x2f9   : > { %1013 = dma.vmem_to_hbm [thread:$0]  (%p1314_p3), %s688_s12, 16, %s1484_s11, %s671_s13  }
 0x2fa   : > { %s1511_s21 = scalar_lea.hbm %s1566_s5, %s826_s26  ;;  %s700_s8 = sshll.u32 %s249_s7, 4  ;;  %s701_s8 = int_to_ptr.vmem [resolvable:$true] %s700_s8 }
 0x2fb   : > { %s675_s27 = scalar_lea.sflag [#allocation6], %s1335_s10  ;;  %s1129_s29 = scalar_lea.vmem %s701_s8, 16 }
 0x2fc   : > { %p1130_p7 = scmp.ne.s32.totalorder %s701_s8, %s1129_s29  ;;  %s1234_s15 = smov [#allocation5]  }
 0x2fd   : > { %s1133_s16 = sshll.u32 %s1234_s15, 4  ;;  %s1134_s16 = int_to_ptr.vmem [resolvable:$false] %s1133_s16 }
 0x2fe   : > { %p1131_p8 = pnand %p1130_p7, %p1314_p3  ;;  %s1135_s0 = scalar_lea.vmem %s1134_s16, 32 }
 0x2ff   : > { %p1136_p11 = scmp.lt.s32.totalorder %s701_s8, %s1134_s16  ;;  %p1137_p12 = scmp.lt.s32.totalorder %s1135_s0, %s1129_s29 }
 0x300   : > { %p1132_p10 = pneg %p1131_p8 }
 0x301   : > { %p1138_p13 = por %p1137_p12, %p1136_p11 }
 0x303   : > { %p1139_p0 = pnand %p1138_p13, %p1132_p10 }
 0x305   : > { %1142 = shalt.err (!%p1139_p0)
}
 0x306   : > { %s1143_s22 = scalar_lea.hbm %s1511_s21, 16  ;;  %s1147_s26 = scalar_lea.hbm %s1566_s5, 64 }
 0x307   : > { %p1144_p1 = scmp.ne.s32.totalorder %s1511_s21, %s1143_s22  ;;  %p1148_p5 = scmp.lt.u32.totalorder %s1511_s21, %s1566_s5 }
 0x308   : > { %p1149_p6 = scmp.lt.u32.totalorder %s1147_s26, %s1143_s22  ;;  %p1151_p8 = scmp.lt.u32.totalorder %s1143_s22, %s1511_s21 }
 0x309   : > { %p1145_p2 = pnand %p1144_p1, %p1314_p3 }
 0x30a   : > { %p1150_p7 = por %p1149_p6, %p1148_p5 }
 0x30b   : > { %p1146_p4 = pneg %p1145_p2 }
 0x30c   : > { %p1152_p10 = por %p1151_p8, %p1150_p7 }
 0x30e   : > { %p1153_p11 = pnand %p1152_p10, %p1146_p4 }
 0x310   : > { %1156 = shalt.err (!%p1153_p11)
}
 0x311   : > { %1014 = dma.vmem_to_hbm [thread:$0]  (%p1314_p3), %s701_s8, 16, %s1511_s21, %s675_s27  }
 0x312 PF: > { %p1024_p12 = scmp.ge.s32.totalorder %s1227_s25, 2  ;;  %s712_s0 = sand.u32 1, %s1199_s18  }
 0x313   : > { %s713_s13 = scalar_lea.sflag [#allocation4], %s712_s0 }
 0x314   : > { %p1018_p13 = pnand %p1024_p12, %p1324_p9 }
 0x316   : > { %1190 = dma.done.wait (!%p1018_p13), %s713_s13, 16  }
 0x317   : > { %1192 = vsyncadd (!%p1018_p13), %s713_s13, 4294967280  ;;  %s721_s14 = scalar_lea.sflag [#allocation6], %s712_s0 }
 0x318   : > { %1194 = dma.done.wait (!%p1018_p13), %s721_s14, 16  }
 0x319   : > { %1196 = vsyncadd (!%p1018_p13), %s721_s14, 4294967280  ;;  %s22_s25 = sadd.s32 1, %s1227_s25   ;;  %s1573_s30 = sld [smem:[#allocation9_spill]] }
 0x31a   : > { %p19_p0 = scmp.ge.s32.totalorder %s22_s25, 10   ;;  %s1574_s18 = smov %s1203_s19 }
 0x31b   : > { %s1575_s19 = smov %s1207_s20  ;;  %s1576_s20 = smov %s1332_s9 }
 0x31c   : > { %s1577_s21 = smov %s1219_s23  ;;  %s1578_s22 = smov %s1223_s24 }
 0x31d   : > { %s1579_s23 = smov %s1582_s28  ;;  %21 = sbr.rel (!%p19_p0) target bundleno = 9 (0x9), region = 96 }
 0x31f   : > { %s1580_s24 = smov %s1573_s30 }
 0x324   :  { %725 = vsyncpa [#allocation4], 1 }
 0x325   :  { %727 = vsyncpa [#allocation4 + $0x1], 1 }
 0x326   :  { %728 = vsyncpa [#allocation6], 1 }
 0x327   :  { %730 = vsyncpa [#allocation6 + $0x1], 1 }

</bundles_post_ra>
